<compile_context>
chip_gen: v5e
topology: v5e:2x2
jax: 0.10.0
libtpu: 0.0.40
codegen_flags: <defaults>
</compile_context>

<pallas_src>
import functools
from typing import NamedTuple

import jax
import jax.numpy as jnp
from jax.experimental import pallas as pl
from jax.experimental.pallas import tpu as pltpu

_LANE = 128
_SUBLANE = 8


def _round_up(x, m):
    return (x + m - 1) // m * m


@functools.lru_cache(maxsize=None)
def _vmem_budgets():
    """(scoped-vmem limit, fused-path budget) derived from the local TPU generation."""
    cap = None
    try:
        cap = getattr(pltpu.get_tpu_info(), "vmem_capacity_bytes", None)
    except Exception:
        cap = None
    if not cap:
        cap = 64 * 1024 * 1024          # conservative default: v7x per-TensorCore VMEM
    return int(cap * 0.85), int(cap * 0.70)


def _pick_tile(dim, desired):
    """Largest multiple of 128 that divides `dim` (itself a multiple of 128) and is <= desired."""
    t = min(desired, dim)
    t = max((t // _LANE) * _LANE, _LANE)
    while dim % t:
        t -= _LANE
    return t


# ------------------------------------------------------------------ fused MLP kernel
def _fused_mlp_kernel(*refs, dims, num_layers, compute_dtype):
    # refs = [x, w0, b0, w1, b1, ..., o, act_a, act_b]
    x_ref = refs[0]
    w_refs = [refs[1 + 2 * i] for i in range(num_layers)]
    b_refs = [refs[2 + 2 * i] for i in range(num_layers)]
    o_ref = refs[1 + 2 * num_layers]
    bufs = (refs[2 + 2 * num_layers], refs[3 + 2 * num_layers])

    for i in range(num_layers):
        d_in, d_out = dims[i], dims[i + 1]
        xin = x_ref[...] if i == 0 else bufs[(i - 1) % 2][:, :d_in]
        y = jnp.dot(xin, w_refs[i][...], preferred_element_type=jnp.float32)
        y = y + b_refs[i][...]                      # bias kept in f32, broadcasts (1, d_out)
        if i < num_layers - 1:
            y = jnp.maximum(y, 0.0)
            bufs[i % 2][:, :d_out] = y.astype(compute_dtype)
        else:
            o_ref[...] = y.astype(o_ref.dtype)


def _mlp_fused(x_pad, ws_pad, bs_pad, dims, tm, out_dtype, compute_dtype,
               vmem_limit, single_buffer_weights=True):
    n_pad = x_pad.shape[0]
    num_layers = len(ws_pad)
    max_hidden = max(dims[1:-1]) if num_layers > 1 else _LANE

    flops = 2 * n_pad * sum(dims[i] * dims[i + 1] for i in range(num_layers))
    bytes_accessed = (
        x_pad.size * x_pad.dtype.itemsize
        + sum(w.size * w.dtype.itemsize for w in ws_pad)
        + sum(b.size * b.dtype.itemsize for b in bs_pad)
        + n_pad * dims[-1] * jnp.dtype(out_dtype).itemsize)

    # Constant-index (VMEM-resident) weights/biases: no double buffering.
    resident = dict(pipeline_mode=pl.Buffered(1)) if single_buffer_weights else {}

    in_specs = [pl.BlockSpec((tm, dims[0]), lambda i: (i, 0))]
    operands = [x_pad]
    for li in range(num_layers):
        in_specs.append(pl.BlockSpec((dims[li], dims[li + 1]), lambda i: (0, 0), **resident))
        in_specs.append(pl.BlockSpec((1, dims[li + 1]), lambda i: (0, 0), **resident))
        operands.append(ws_pad[li])
        operands.append(bs_pad[li])

    kernel = functools.partial(_fused_mlp_kernel, dims=tuple(dims),
                               num_layers=num_layers, compute_dtype=compute_dtype)
    # TODO(synk): on v7x mark the row axis pltpu.CORE_PARALLEL (2 TCs/chip) when n_pad//tm >= 2.
    return pl.pallas_call(
        kernel,
        out_shape=jax.ShapeDtypeStruct((n_pad, dims[-1]), out_dtype),
        grid_spec=pltpu.PrefetchScalarGridSpec(
            num_scalar_prefetch=0,
            grid=(n_pad // tm,),
            in_specs=in_specs,
            out_specs=pl.BlockSpec((tm, dims[-1]), lambda i: (i, 0)),
            scratch_shapes=[pltpu.VMEM((tm, max_hidden), compute_dtype),
                            pltpu.VMEM((tm, max_hidden), compute_dtype)],
        ),
        compiler_params=pltpu.CompilerParams(
            dimension_semantics=("parallel",),
            vmem_limit_bytes=vmem_limit),
        cost_estimate=pl.CostEstimate(flops=flops, transcendentals=0,
                                      bytes_accessed=bytes_accessed),
    )(*operands)


# ------------------------------------------------------------- per-layer tiled fallback
def _linear_tiled_kernel(x_ref, w_ref, b_ref, o_ref, acc_ref, *, apply_relu):
    k = pl.program_id(2)

    @pl.when(k == 0)
    def _():
        acc_ref[...] = jnp.zeros_like(acc_ref)

    acc_ref[...] += jnp.dot(x_ref[...], w_ref[...],
                            preferred_element_type=jnp.float32)

    @pl.when(k == pl.num_programs(2) - 1)
    def _():
        y = acc_ref[...] + b_ref[...]               # bias+ReLU+cast fused into the store
        if apply_relu:
            y = jnp.maximum(y, 0.0)
        o_ref[...] = y.astype(o_ref.dtype)


def _linear_tiled(x_pad, w_pad, b_pad, apply_relu, tm, out_dtype, vmem_limit):
    n_pad, k_pad = x_pad.shape
    _, m_pad = w_pad.shape
    # prepare_mlp_params aligns feature dims to 256 for models expected to hit this path,
    # so these stay >=256 (full-width MXU on v6e/v7x) instead of collapsing to 128.
    tn = _pick_tile(m_pad, 256)
    tk = _pick_tile(k_pad, 512)

    flops = 2 * n_pad * k_pad * m_pad
    bytes_accessed = (x_pad.size * x_pad.dtype.itemsize
                      + w_pad.size * w_pad.dtype.itemsize
                      + b_pad.size * b_pad.dtype.itemsize
                      + n_pad * m_pad * jnp.dtype(out_dtype).itemsize)

    kernel = functools.partial(_linear_tiled_kernel, apply_relu=apply_relu)
    return pl.pallas_call(
        kernel,
        out_shape=jax.ShapeDtypeStruct((n_pad, m_pad), out_dtype),
        grid_spec=pltpu.PrefetchScalarGridSpec(
            num_scalar_prefetch=0,
            grid=(n_pad // tm, m_pad // tn, k_pad // tk),
            in_specs=[
                pl.BlockSpec((tm, tk), lambda i, j, k: (i, k)),
                pl.BlockSpec((tk, tn), lambda i, j, k: (k, j)),
                pl.BlockSpec((1, tn), lambda i, j, k: (0, j)),
            ],
            out_specs=pl.BlockSpec((tm, tn), lambda i, j, k: (i, j)),
            scratch_shapes=[pltpu.VMEM((tm, tn), jnp.float32)],
        ),
        compiler_params=pltpu.CompilerParams(
            dimension_semantics=("parallel", "parallel", "arbitrary"),
            vmem_limit_bytes=vmem_limit),
        cost_estimate=pl.CostEstimate(flops=flops, transcendentals=0,
                                      bytes_accessed=bytes_accessed),
    )(x_pad, w_pad, b_pad)


# ------------------------------------------------------------------------- wrappers
def init_mlp_params(key, input_dim, hidden_dim, output_dim, num_layers,
                    dtype=jnp.float32):
    """Deterministic synthetic init. Weight layout: (in_features, out_features)."""
    h = [hidden_dim] * (num_layers - 1)
    dims_in = [input_dim] + h
    dims_out = h + [output_dim]
    params = []
    for n_in, n_out in zip(dims_in, dims_out):
        key, kw, kb = jax.random.split(key, 3)
        bound = 1.0 / (n_in ** 0.5)       # mimic PyTorch U(-1/sqrt(fan_in), 1/sqrt(fan_in))
        w = jax.random.uniform(kw, (n_in, n_out), dtype, -bound, bound)
        b = jax.random.uniform(kb, (n_out,), dtype, -bound, bound)
        params.append((w, b))
    return params


class PreparedMLP(NamedTuple):
    ws: tuple            # padded (in, out) weights in compute dtype
    bs: tuple            # padded (1, out) biases in float32
    dims: tuple          # padded feature dims
    dims_raw: tuple      # original feature dims


def prepare_mlp_params(params, compute_dtype=jnp.bfloat16, fused_vmem_budget=None):
    """Pad + cast weights ONCE (hoisted out of the per-call forward pass).

    Feature dims are aligned to 128 lanes; if the weights clearly cannot be VMEM-resident
    (tiled-fallback models) they are aligned to 256 so the fallback gets >=256-wide tiles.
    """
    compute_dtype = jnp.dtype(compute_dtype)
    if fused_vmem_budget is None:
        fused_vmem_budget = _vmem_budgets()[1]

    num_layers = len(params)
    dims_raw = tuple([params[0][0].shape[0]] + [w.shape[1] for w, _ in params])

    dims128 = [_round_up(d, _LANE) for d in dims_raw]
    weight_bytes = (sum(dims128[i] * dims128[i + 1] for i in range(num_layers))
                    * compute_dtype.itemsize)
    align = _LANE if weight_bytes <= fused_vmem_budget else 2 * _LANE
    dims = tuple(_round_up(d, align) for d in dims_raw)

    ws, bs = [], []
    for li, (w, b) in enumerate(params):
        w = jnp.asarray(w).astype(compute_dtype)
        b = jnp.asarray(b).astype(jnp.float32).reshape(1, -1)
        pad_in = dims[li] - dims_raw[li]
        pad_out = dims[li + 1] - dims_raw[li + 1]
        if pad_in or pad_out:
            w = jnp.pad(w, ((0, pad_in), (0, pad_out)))
        if pad_out:
            b = jnp.pad(b, ((0, 0), (0, pad_out)))
        ws.append(w)
        bs.append(b)
    # TODO(synk): optional fp8 (e4m3) weight storage for v7x behind an accuracy flag.
    return PreparedMLP(tuple(ws), tuple(bs), dims, dims_raw)


def mlp_forward(x, params=None, *, prepared=None, compute_dtype=jnp.bfloat16,
                max_fused_vmem_bytes=None):
    """x: [..., input_dim] -> [..., output_dim]; ReLU after every layer but the last."""
    vmem_limit, default_budget = _vmem_budgets()
    if max_fused_vmem_bytes is None:
        max_fused_vmem_bytes = default_budget
    if prepared is None:
        prepared = prepare_mlp_params(params, compute_dtype,
                                      fused_vmem_budget=max_fused_vmem_bytes)

    ws, bs, dims, dims_raw = prepared
    compute_dtype = jnp.dtype(ws[0].dtype)
    out_dtype = x.dtype
    c_item = compute_dtype.itemsize
    o_item = jnp.dtype(out_dtype).itemsize
    num_layers = len(ws)
    assert x.shape[-1] == dims_raw[0], "input feature dim mismatch"

    lead = x.shape[:-1]
    x2d = x.reshape(-1, dims_raw[0])
    n = max(x2d.shape[0], 1)

    # --- path & row-tile selection -------------------------------------------------
    max_hidden = max(dims[1:-1]) if num_layers > 1 else _LANE
    weight_bytes = sum(w.size for w in ws) * c_item + sum(b.size for b in bs) * 4

    def fused_vmem(tm):
        # weights/biases x1 (Buffered(1)); x/out double-buffered; two ping-pong scratch bufs.
        return (weight_bytes
                + 2 * tm * dims[0] * c_item
                + 2 * tm * dims[-1] * o_item
                + 2 * tm * max_hidden * c_item)

    tm_cap = min(512, _round_up(n, _SUBLANE))
    tm_candidates = [t for t in (512, 256, 128) if t <= tm_cap] or [tm_cap]
    tm_fused = next((t for t in tm_candidates
                     if fused_vmem(t) <= max_fused_vmem_bytes), None)
    use_fused = tm_fused is not None

    tm = tm_fused if use_fused else min(512, _round_up(n, _SUBLANE))
    n_pad = _round_up(n, tm)

    # --- pad activations only when actually needed ----------------------------------
    x_c = x2d.astype(compute_dtype)
    if n_pad != x2d.shape[0] or dims[0] != dims_raw[0]:
        x_c = jnp.pad(x_c, ((0, n_pad - x2d.shape[0]), (0, dims[0] - dims_raw[0])))

    if use_fused:
        try:
            out_pad = _mlp_fused(x_c, ws, bs, dims, tm, out_dtype, compute_dtype,
                                 vmem_limit, single_buffer_weights=True)
        except Exception:
            # Compatibility fallback if pipeline_mode=pl.Buffered is unavailable.
            out_pad = _mlp_fused(x_c, ws, bs, dims, tm, out_dtype, compute_dtype,
                                 vmem_limit, single_buffer_weights=False)
    else:
        # TODO(synk): replace with a single-kernel weight-streaming version
        # (pltpu.emit_pipeline over out-feature/K chunks) so intermediate activations
        # never round-trip HBM even when the weights exceed VMEM.
        cur = x_c
        for li in range(num_layers):
            last = li == num_layers - 1
            cur = _linear_tiled(cur, ws[li], bs[li], apply_relu=not last, tm=tm,
                                out_dtype=out_dtype if last else compute_dtype,
                                vmem_limit=vmem_limit)
        out_pad = cur

    out = out_pad
    if n_pad != x2d.shape[0] or dims[-1] != dims_raw[-1]:
        out = out[:x2d.shape[0], :dims_raw[-1]]
    return out.astype(out_dtype).reshape(*lead, dims_raw[-1])


def mlp_reference(x, params):
    num_layers = len(params)
    for i, (w, b) in enumerate(params):
        x = x @ w + b
        if i < num_layers - 1:
            x = jnp.maximum(x, 0.0)
    return x


if __name__ == "__main__":
    key = jax.random.PRNGKey(0)
    k_x, k_p = jax.random.split(key)

    batch, seq = 2, 8
    input_dim, hidden_dim, output_dim, num_layers = 16, 32, 16, 3

    x = jax.random.normal(k_x, (batch, seq, input_dim), jnp.float32)
    params = init_mlp_params(k_p, input_dim, hidden_dim, output_dim, num_layers)
    ref = mlp_reference(x, params)

    # 1) default path: bf16 MXU compute (f32 accumulation), fused single-kernel MLP
    prepared_bf16 = prepare_mlp_params(params)               # pad/cast once, reuse per call
    out_bf16 = jax.block_until_ready(mlp_forward(x, prepared=prepared_bf16))
    assert out_bf16.shape == (batch, seq, output_dim)
    assert out_bf16.dtype == x.dtype
    assert jnp.allclose(out_bf16, ref, atol=5e-2, rtol=5e-2)

    # 2) f32 compute, fused path (tight tolerance)
    prepared_f32 = prepare_mlp_params(params, compute_dtype=jnp.float32)
    out_f32 = jax.block_until_ready(mlp_forward(x, prepared=prepared_f32))
    assert jnp.allclose(out_f32, ref, atol=1e-5, rtol=1e-5)

    # 3) per-layer tiled-matmul fallback (forced via zero fused-VMEM budget), f32
    out_tiled = jax.block_until_ready(
        mlp_forward(x, prepared=prepared_f32, max_fused_vmem_bytes=0))
    assert out_tiled.shape == (batch, seq, output_dim)
    assert jnp.allclose(out_tiled, ref, atol=1e-5, rtol=1e-5)

    print("KERNEL_OK")
</pallas_src>

<mosaic_0001>
module attributes {stable_mosaic.version = 11 : i64} {
  func.func @_fused_mlp_kernel(%arg0: i32, %arg1: memref<16x128xbf16, #tpu.memory_space<vmem>>, %arg2: memref<128x128xbf16, #tpu.memory_space<vmem>>, %arg3: memref<1x128xf32, #tpu.memory_space<vmem>>, %arg4: memref<128x128xbf16, #tpu.memory_space<vmem>>, %arg5: memref<1x128xf32, #tpu.memory_space<vmem>>, %arg6: memref<128x128xbf16, #tpu.memory_space<vmem>>, %arg7: memref<1x128xf32, #tpu.memory_space<vmem>>, %arg8: memref<16x128xf32, #tpu.memory_space<vmem>>, %arg9: memref<16x128xbf16, #tpu.memory_space<vmem>>, %arg10: memref<16x128xbf16, #tpu.memory_space<vmem>>) attributes {dimension_semantics = [#tpu.dimension_semantics<parallel>], iteration_bounds = array<i64: 1>, scalar_prefetch = 0 : i64, scratch_operands = 2 : i64, tpu.core_type = #tpu.core_type<tc>, window_params = [{transform_indices = @transform_0, window_bounds = array<i64: 16, 128>}, {pipeline_mode = #tpu.pipeline_mode<synchronous>, transform_indices = @transform_1, window_bounds = array<i64: 128, 128>}, {pipeline_mode = #tpu.pipeline_mode<synchronous>, transform_indices = @transform_2, window_bounds = array<i64: 1, 128>}, {pipeline_mode = #tpu.pipeline_mode<synchronous>, transform_indices = @transform_3, window_bounds = array<i64: 128, 128>}, {pipeline_mode = #tpu.pipeline_mode<synchronous>, transform_indices = @transform_4, window_bounds = array<i64: 1, 128>}, {pipeline_mode = #tpu.pipeline_mode<synchronous>, transform_indices = @transform_5, window_bounds = array<i64: 128, 128>}, {pipeline_mode = #tpu.pipeline_mode<synchronous>, transform_indices = @transform_6, window_bounds = array<i64: 1, 128>}, {transform_indices = @transform_7, window_bounds = array<i64: 16, 128>}]} {
    %c0 = arith.constant 0 : index
    %c0_0 = arith.constant 0 : index
    %0 = vector.load %arg1[%c0, %c0_0] : memref<16x128xbf16, #tpu.memory_space<vmem>>, vector<16x128xbf16>
    %c0_1 = arith.constant 0 : index
    %c0_2 = arith.constant 0 : index
    %1 = vector.load %arg2[%c0_1, %c0_2] : memref<128x128xbf16, #tpu.memory_space<vmem>>, vector<128x128xbf16>
    %cst = arith.constant dense<0.000000e+00> : vector<16x128xf32>
    %2 = tpu.matmul %0, %1, %cst {dimension_numbers = #tpu.dot_dimension_numbers<[1], [0], [0], [1], [0, 0, 1, 1], [], []>} : vector<16x128xbf16>, vector<128x128xbf16>, vector<16x128xf32> -> vector<16x128xf32>
    %c0_3 = arith.constant 0 : index
    %c0_4 = arith.constant 0 : index
    %3 = vector.load %arg3[%c0_3, %c0_4] : memref<1x128xf32, #tpu.memory_space<vmem>>, vector<1x128xf32>
    %4 = vector.broadcast %3 : vector<1x128xf32> to vector<16x128xf32>
    %5 = arith.addf %2, %4 : vector<16x128xf32>
    %cst_5 = arith.constant 0.000000e+00 : f32
    %6 = vector.broadcast %cst_5 : f32 to vector<16x128xf32>
    %7 = arith.maximumf %5, %6 : vector<16x128xf32>
    %8 = arith.truncf %7 : vector<16x128xf32> to vector<16x128xbf16>
    %c0_6 = arith.constant 0 : index
    %c0_7 = arith.constant 0 : index
    %9 = vector.load %arg9[%c0_6, %c0_7] : memref<16x128xbf16, #tpu.memory_space<vmem>>, vector<16x128xbf16>
    tpu.vector_store %arg9[%c0_6, %c0_7], %8 {strides = array<i32>} : memref<16x128xbf16, #tpu.memory_space<vmem>>, vector<16x128xbf16>,
    %c0_8 = arith.constant 0 : index
    %c0_9 = arith.constant 0 : index
    %10 = vector.load %arg9[%c0_8, %c0_9] : memref<16x128xbf16, #tpu.memory_space<vmem>>, vector<16x128xbf16>
    %c0_10 = arith.constant 0 : index
    %c0_11 = arith.constant 0 : index
    %11 = vector.load %arg4[%c0_10, %c0_11] : memref<128x128xbf16, #tpu.memory_space<vmem>>, vector<128x128xbf16>
    %cst_12 = arith.constant dense<0.000000e+00> : vector<16x128xf32>
    %12 = tpu.matmul %10, %11, %cst_12 {dimension_numbers = #tpu.dot_dimension_numbers<[1], [0], [0], [1], [0, 0, 1, 1], [], []>} : vector<16x128xbf16>, vector<128x128xbf16>, vector<16x128xf32> -> vector<16x128xf32>
    %c0_13 = arith.constant 0 : index
    %c0_14 = arith.constant 0 : index
    %13 = vector.load %arg5[%c0_13, %c0_14] : memref<1x128xf32, #tpu.memory_space<vmem>>, vector<1x128xf32>
    %14 = vector.broadcast %13 : vector<1x128xf32> to vector<16x128xf32>
    %15 = arith.addf %12, %14 : vector<16x128xf32>
    %cst_15 = arith.constant 0.000000e+00 : f32
    %16 = vector.broadcast %cst_15 : f32 to vector<16x128xf32>
    %17 = arith.maximumf %15, %16 : vector<16x128xf32>
    %18 = arith.truncf %17 : vector<16x128xf32> to vector<16x128xbf16>
    %c0_16 = arith.constant 0 : index
    %c0_17 = arith.constant 0 : index
    %19 = vector.load %arg10[%c0_16, %c0_17] : memref<16x128xbf16, #tpu.memory_space<vmem>>, vector<16x128xbf16>
    tpu.vector_store %arg10[%c0_16, %c0_17], %18 {strides = array<i32>} : memref<16x128xbf16, #tpu.memory_space<vmem>>, vector<16x128xbf16>,
    %c0_18 = arith.constant 0 : index
    %c0_19 = arith.constant 0 : index
    %20 = vector.load %arg10[%c0_18, %c0_19] : memref<16x128xbf16, #tpu.memory_space<vmem>>, vector<16x128xbf16>
    %c0_20 = arith.constant 0 : index
    %c0_21 = arith.constant 0 : index
    %21 = vector.load %arg6[%c0_20, %c0_21] : memref<128x128xbf16, #tpu.memory_space<vmem>>, vector<128x128xbf16>
    %cst_22 = arith.constant dense<0.000000e+00> : vector<16x128xf32>
    %22 = tpu.matmul %20, %21, %cst_22 {dimension_numbers = #tpu.dot_dimension_numbers<[1], [0], [0], [1], [0, 0, 1, 1], [], []>} : vector<16x128xbf16>, vector<128x128xbf16>, vector<16x128xf32> -> vector<16x128xf32>
    %c0_23 = arith.constant 0 : index
    %c0_24 = arith.constant 0 : index
    %23 = vector.load %arg7[%c0_23, %c0_24] : memref<1x128xf32, #tpu.memory_space<vmem>>, vector<1x128xf32>
    %24 = vector.broadcast %23 : vector<1x128xf32> to vector<16x128xf32>
    %25 = arith.addf %22, %24 : vector<16x128xf32>
    %c0_25 = arith.constant 0 : index
    %c0_26 = arith.constant 0 : index
    %26 = vector.load %arg8[%c0_25, %c0_26] : memref<16x128xf32, #tpu.memory_space<vmem>>, vector<16x128xf32>
    tpu.vector_store %arg8[%c0_25, %c0_26], %25 {strides = array<i32>} : memref<16x128xf32, #tpu.memory_space<vmem>>, vector<16x128xf32>,
    return
  }
  func.func @transform_0(%arg0: i32) -> (i32, i32) {
    %c0_i32 = arith.constant 0 : i32
    %c0_i32_0 = arith.constant 0 : i32
    return %arg0, %c0_i32 : i32, i32
  }
  func.func @transform_1(%arg0: i32) -> (i32, i32) {
    %c0_i32 = arith.constant 0 : i32
    %c0_i32_0 = arith.constant 0 : i32
    %c0_i32_1 = arith.constant 0 : i32
    return %c0_i32, %c0_i32_0 : i32, i32
  }
  func.func @transform_2(%arg0: i32) -> (i32, i32) {
    %c0_i32 = arith.constant 0 : i32
    %c0_i32_0 = arith.constant 0 : i32
    %c0_i32_1 = arith.constant 0 : i32
    return %c0_i32, %c0_i32_0 : i32, i32
  }
  func.func @transform_3(%arg0: i32) -> (i32, i32) {
    %c0_i32 = arith.constant 0 : i32
    %c0_i32_0 = arith.constant 0 : i32
    %c0_i32_1 = arith.constant 0 : i32
    return %c0_i32, %c0_i32_0 : i32, i32
  }
  func.func @transform_4(%arg0: i32) -> (i32, i32) {
    %c0_i32 = arith.constant 0 : i32
    %c0_i32_0 = arith.constant 0 : i32
    %c0_i32_1 = arith.constant 0 : i32
    return %c0_i32, %c0_i32_0 : i32, i32
  }
  func.func @transform_5(%arg0: i32) -> (i32, i32) {
    %c0_i32 = arith.constant 0 : i32
    %c0_i32_0 = arith.constant 0 : i32
    %c0_i32_1 = arith.constant 0 : i32
    return %c0_i32, %c0_i32_0 : i32, i32
  }
  func.func @transform_6(%arg0: i32) -> (i32, i32) {
    %c0_i32 = arith.constant 0 : i32
    %c0_i32_0 = arith.constant 0 : i32
    %c0_i32_1 = arith.constant 0 : i32
    return %c0_i32, %c0_i32_0 : i32, i32
  }
  func.func @transform_7(%arg0: i32) -> (i32, i32) {
    %c0_i32 = arith.constant 0 : i32
    %c0_i32_0 = arith.constant 0 : i32
    return %arg0, %c0_i32 : i32, i32
  }
}

module attributes {stable_mosaic.version = 11 : i64} {
  func.func @_fused_mlp_kernel(%arg0: i32, %arg1: memref<16x128xbf16, #tpu.memory_space<vmem>>, %arg2: memref<128x128xbf16, #tpu.memory_space<vmem>>, %arg3: memref<1x128xf32, #tpu.memory_space<vmem>>, %arg4: memref<128x128xbf16, #tpu.memory_space<vmem>>, %arg5: memref<1x128xf32, #tpu.memory_space<vmem>>, %arg6: memref<128x128xbf16, #tpu.memory_space<vmem>>, %arg7: memref<1x128xf32, #tpu.memory_space<vmem>>, %arg8: memref<16x128xf32, #tpu.memory_space<vmem>>, %arg9: memref<16x128xbf16, #tpu.memory_space<vmem>>, %arg10: memref<16x128xbf16, #tpu.memory_space<vmem>>) attributes {dimension_semantics = [#tpu.dimension_semantics<parallel>], iteration_bounds = array<i64: 1>, scalar_prefetch = 0 : i64, scratch_operands = 2 : i64, tpu.core_type = #tpu.core_type<tc>, window_params = [{transform_indices = @transform_0, window_bounds = array<i64: 16, 128>}, {pipeline_mode = #tpu.pipeline_mode<synchronous>, transform_indices = @transform_1, window_bounds = array<i64: 128, 128>}, {pipeline_mode = #tpu.pipeline_mode<synchronous>, transform_indices = @transform_2, window_bounds = array<i64: 1, 128>}, {pipeline_mode = #tpu.pipeline_mode<synchronous>, transform_indices = @transform_3, window_bounds = array<i64: 128, 128>}, {pipeline_mode = #tpu.pipeline_mode<synchronous>, transform_indices = @transform_4, window_bounds = array<i64: 1, 128>}, {pipeline_mode = #tpu.pipeline_mode<synchronous>, transform_indices = @transform_5, window_bounds = array<i64: 128, 128>}, {pipeline_mode = #tpu.pipeline_mode<synchronous>, transform_indices = @transform_6, window_bounds = array<i64: 1, 128>}, {transform_indices = @transform_7, window_bounds = array<i64: 16, 128>}]} {
    %c0 = arith.constant 0 : index
    %c0_0 = arith.constant 0 : index
    %0 = vector.load %arg1[%c0, %c0_0] : memref<16x128xbf16, #tpu.memory_space<vmem>>, vector<16x128xbf16>
    %c0_1 = arith.constant 0 : index
    %c0_2 = arith.constant 0 : index
    %1 = vector.load %arg2[%c0_1, %c0_2] : memref<128x128xbf16, #tpu.memory_space<vmem>>, vector<128x128xbf16>
    %cst = arith.constant dense<0.000000e+00> : vector<16x128xf32>
    %2 = tpu.matmul %0, %1, %cst {dimension_numbers = #tpu.dot_dimension_numbers<[1], [0], [0], [1], [0, 0, 1, 1], [], []>} : vector<16x128xbf16>, vector<128x128xbf16>, vector<16x128xf32> -> vector<16x128xf32>
    %c0_3 = arith.constant 0 : index
    %c0_4 = arith.constant 0 : index
    %3 = vector.load %arg3[%c0_3, %c0_4] : memref<1x128xf32, #tpu.memory_space<vmem>>, vector<1x128xf32>
    %4 = vector.broadcast %3 : vector<1x128xf32> to vector<16x128xf32>
    %5 = arith.addf %2, %4 : vector<16x128xf32>
    %cst_5 = arith.constant 0.000000e+00 : f32
    %6 = vector.broadcast %cst_5 : f32 to vector<16x128xf32>
    %7 = arith.maximumf %5, %6 : vector<16x128xf32>
    %8 = arith.truncf %7 : vector<16x128xf32> to vector<16x128xbf16>
    %c0_6 = arith.constant 0 : index
    %c0_7 = arith.constant 0 : index
    %9 = vector.load %arg9[%c0_6, %c0_7] : memref<16x128xbf16, #tpu.memory_space<vmem>>, vector<16x128xbf16>
    tpu.vector_store %arg9[%c0_6, %c0_7], %8 {strides = array<i32>} : memref<16x128xbf16, #tpu.memory_space<vmem>>, vector<16x128xbf16>,
    %c0_8 = arith.constant 0 : index
    %c0_9 = arith.constant 0 : index
    %10 = vector.load %arg9[%c0_8, %c0_9] : memref<16x128xbf16, #tpu.memory_space<vmem>>, vector<16x128xbf16>
    %c0_10 = arith.constant 0 : index
    %c0_11 = arith.constant 0 : index
    %11 = vector.load %arg4[%c0_10, %c0_11] : memref<128x128xbf16, #tpu.memory_space<vmem>>, vector<128x128xbf16>
    %cst_12 = arith.constant dense<0.000000e+00> : vector<16x128xf32>
    %12 = tpu.matmul %10, %11, %cst_12 {dimension_numbers = #tpu.dot_dimension_numbers<[1], [0], [0], [1], [0, 0, 1, 1], [], []>} : vector<16x128xbf16>, vector<128x128xbf16>, vector<16x128xf32> -> vector<16x128xf32>
    %c0_13 = arith.constant 0 : index
    %c0_14 = arith.constant 0 : index
    %13 = vector.load %arg5[%c0_13, %c0_14] : memref<1x128xf32, #tpu.memory_space<vmem>>, vector<1x128xf32>
    %14 = vector.broadcast %13 : vector<1x128xf32> to vector<16x128xf32>
    %15 = arith.addf %12, %14 : vector<16x128xf32>
    %cst_15 = arith.constant 0.000000e+00 : f32
    %16 = vector.broadcast %cst_15 : f32 to vector<16x128xf32>
    %17 = arith.maximumf %15, %16 : vector<16x128xf32>
    %18 = arith.truncf %17 : vector<16x128xf32> to vector<16x128xbf16>
    %c0_16 = arith.constant 0 : index
    %c0_17 = arith.constant 0 : index
    %19 = vector.load %arg10[%c0_16, %c0_17] : memref<16x128xbf16, #tpu.memory_space<vmem>>, vector<16x128xbf16>
    tpu.vector_store %arg10[%c0_16, %c0_17], %18 {strides = array<i32>} : memref<16x128xbf16, #tpu.memory_space<vmem>>, vector<16x128xbf16>,
    %c0_18 = arith.constant 0 : index
    %c0_19 = arith.constant 0 : index
    %20 = vector.load %arg10[%c0_18, %c0_19] : memref<16x128xbf16, #tpu.memory_space<vmem>>, vector<16x128xbf16>
    %c0_20 = arith.constant 0 : index
    %c0_21 = arith.constant 0 : index
    %21 = vector.load %arg6[%c0_20, %c0_21] : memref<128x128xbf16, #tpu.memory_space<vmem>>, vector<128x128xbf16>
    %cst_22 = arith.constant dense<0.000000e+00> : vector<16x128xf32>
    %22 = tpu.matmul %20, %21, %cst_22 {dimension_numbers = #tpu.dot_dimension_numbers<[1], [0], [0], [1], [0, 0, 1, 1], [], []>} : vector<16x128xbf16>, vector<128x128xbf16>, vector<16x128xf32> -> vector<16x128xf32>
    %c0_23 = arith.constant 0 : index
    %c0_24 = arith.constant 0 : index
    %23 = vector.load %arg7[%c0_23, %c0_24] : memref<1x128xf32, #tpu.memory_space<vmem>>, vector<1x128xf32>
    %24 = vector.broadcast %23 : vector<1x128xf32> to vector<16x128xf32>
    %25 = arith.addf %22, %24 : vector<16x128xf32>
    %c0_25 = arith.constant 0 : index
    %c0_26 = arith.constant 0 : index
    %26 = vector.load %arg8[%c0_25, %c0_26] : memref<16x128xf32, #tpu.memory_space<vmem>>, vector<16x128xf32>
    tpu.vector_store %arg8[%c0_25, %c0_26], %25 {strides = array<i32>} : memref<16x128xf32, #tpu.memory_space<vmem>>, vector<16x128xf32>,
    return
  }
  func.func @transform_0(%arg0: i32) -> (i32, i32) {
    %c0_i32 = arith.constant 0 : i32
    %c0_i32_0 = arith.constant 0 : i32
    return %arg0, %c0_i32 : i32, i32
  }
  func.func @transform_1(%arg0: i32) -> (i32, i32) {
    %c0_i32 = arith.constant 0 : i32
    %c0_i32_0 = arith.constant 0 : i32
    %c0_i32_1 = arith.constant 0 : i32
    return %c0_i32, %c0_i32_0 : i32, i32
  }
  func.func @transform_2(%arg0: i32) -> (i32, i32) {
    %c0_i32 = arith.constant 0 : i32
    %c0_i32_0 = arith.constant 0 : i32
    %c0_i32_1 = arith.constant 0 : i32
    return %c0_i32, %c0_i32_0 : i32, i32
  }
  func.func @transform_3(%arg0: i32) -> (i32, i32) {
    %c0_i32 = arith.constant 0 : i32
    %c0_i32_0 = arith.constant 0 : i32
    %c0_i32_1 = arith.constant 0 : i32
    return %c0_i32, %c0_i32_0 : i32, i32
  }
  func.func @transform_4(%arg0: i32) -> (i32, i32) {
    %c0_i32 = arith.constant 0 : i32
    %c0_i32_0 = arith.constant 0 : i32
    %c0_i32_1 = arith.constant 0 : i32
    return %c0_i32, %c0_i32_0 : i32, i32
  }
  func.func @transform_5(%arg0: i32) -> (i32, i32) {
    %c0_i32 = arith.constant 0 : i32
    %c0_i32_0 = arith.constant 0 : i32
    %c0_i32_1 = arith.constant 0 : i32
    return %c0_i32, %c0_i32_0 : i32, i32
  }
  func.func @transform_6(%arg0: i32) -> (i32, i32) {
    %c0_i32 = arith.constant 0 : i32
    %c0_i32_0 = arith.constant 0 : i32
    %c0_i32_1 = arith.constant 0 : i32
    return %c0_i32, %c0_i32_0 : i32, i32
  }
  func.func @transform_7(%arg0: i32) -> (i32, i32) {
    %c0_i32 = arith.constant 0 : i32
    %c0_i32_0 = arith.constant 0 : i32
    return %arg0, %c0_i32 : i32, i32
  }
}

</mosaic_0001>

<bundles_post_ra>
// kernel: tpu_custom_call.1
= control target key start
LH: loop header
LB: loop body
LE: loop exit
PB: predicated region body
PF: predicated region fallthrough
CT: control target
= control target key end

     0   :  { %12 = vsyncpa [#allocation5], 0  ;;  %s753_s0 = inlined_call_operand.hbm [shape: bf16[16,128], index: 0, kind: input, shape index: {}]   ;;  %s754_s1 = inlined_call_operand.hbm [shape: bf16[128,128], index: 1, kind: input, shape index: {}]   ;;  %s755_s2 = inlined_call_operand.vmem [shape: f32[1,128], index: 2, kind: input, shape index: {}]   ;;  %s756_s3 = inlined_call_operand.hbm [shape: bf16[128,128], index: 3, kind: input, shape index: {}]   ;;  %s757_s4 = inlined_call_operand.vmem [shape: f32[1,128], index: 4, kind: input, shape index: {}]   ;;  %s758_s5 = inlined_call_operand.hbm [shape: bf16[128,128], index: 5, kind: input, shape index: {}]   ;;  %s759_s6 = inlined_call_operand.vmem [shape: f32[1,128], index: 6, kind: input, shape index: {}]   ;;  %s760_s7 = inlined_call_operand.hbm [shape: f32[16,128], index: 7, kind: output, shape index: {}]  }
   0x1   :  { %13 = vsyncpa [#allocation8], 0 }
   0x2   :  { %14 = vsyncpa [#allocation11], 0 }
   0x3   :  { %15 = vsyncpa [#allocation6], 0  ;;  %s33_s26 = sshll.u32 %s754_s1, 4  ;;  %s680_s27 = smov [#allocation7]   ;;  %s34_s26 = int_to_ptr.hbm [resolvable:$true] %s33_s26 }
   0x4   :  { %s35_s28 = sshll.u32 %s680_s27, 4  ;;  %s20_s8 = sshll.u32 %s753_s0, 4  ;;  %s36_s28 = int_to_ptr.vmem [resolvable:$true] %s35_s28  ;;  %s21_s8 = int_to_ptr.hbm [resolvable:$true] %s20_s8 }
   0x5   :  { %s681_s9 = smov 64   ;;  %s682_s10 = smov 4  }
   0x6   :  { %41 = dma.hbm_to_vmem [thread:$0]  %s34_s26, 1024, %s36_s28, [#allocation8], %s681_s9, %s681_s9, %s682_s10  }
   0x7   :  { %s683_s11 = smov [#allocation4]   ;;  %s48_s15 = sshll.u32 %s756_s3, 4  ;;  %s49_s15 = int_to_ptr.hbm [resolvable:$true] %s48_s15 }
   0x8   :  { %s22_s12 = sshll.u32 %s683_s11, 4  ;;  %s63_s17 = sshll.u32 %s758_s5, 4  ;;  %s23_s12 = int_to_ptr.vmem [resolvable:$true] %s22_s12  ;;  %s64_s17 = int_to_ptr.hbm [resolvable:$true] %s63_s17 }
   0x9   :  { %28 = dma.hbm_to_vmem [thread:$0]  %s21_s8, 128, %s23_s12, [#allocation5], %s681_s9, %s681_s9, %s682_s10  }
   0xa   :  { %s684_s18 = smov [#allocation9]   ;;  %s685_s0 = smov [#allocation10]  }
   0xb   :  { %s50_s19 = sshll.u32 %s684_s18, 4  ;;  %s65_s20 = sshll.u32 %s685_s0, 4  ;;  %s51_s19 = int_to_ptr.vmem [resolvable:$true] %s50_s19  ;;  %s66_s20 = int_to_ptr.vmem [resolvable:$true] %s65_s20 }
   0xc   :  { %56 = dma.hbm_to_vmem [thread:$0]  %s49_s15, 1024, %s51_s19, [#allocation8], %s681_s9, %s681_s9, %s682_s10  }
   0xd   :  { %71 = dma.hbm_to_vmem [thread:$0]  %s64_s17, 1024, %s66_s20, [#allocation11], %s681_s9, %s681_s9, %s682_s10  }
   0xe   :  { %672 = dma.done.wait [#allocation5], 128  }
   0xf   :  { %673 = vsyncadd [#allocation5], 4294967168 }
  0x10   :  { %674 = dma.done.wait [#allocation8], 2048  }
  0x11   :  { %675 = vsyncadd [#allocation8], 4294965248 }
  0x12   :  { %676 = dma.done.wait [#allocation11], 1024  }
  0x13   :  { %677 = vsyncadd [#allocation11], 4294966272  ;;  %v511_v0 = vld [vmem:[#allocation7 + $0x38] sm:$0xff]  ;;  %v510_v1 = vld [vmem:[#allocation7 + $0x30] sm:$0xff]  ;;  %s686_s24 = smov [#allocation12]   ;;  %s380_s27 = sshll.u32 %s760_s7, 4  ;;  %s381_s27 = int_to_ptr.hbm [resolvable:$true] %s380_s27 }
  0x14   :  { %166 = vmatpush.bf16.msra.mxu0 %v511_v0  ;;  %v520_v2 = vld [vmem:[#allocation9 + $0x38] sm:$0xff]  ;;  %v519_v3 = vld [vmem:[#allocation9 + $0x30] sm:$0xff]  ;;  %v509_v4 = vld [vmem:[#allocation7 + $0x28] sm:$0xff]  ;;  %s378_s25 = sshll.u32 %s686_s24, 4  ;;  %s687_s28 = smov 128   ;;  %s379_s25 = int_to_ptr.vmem [resolvable:$true] %s378_s25 }
  0x15   :  { %262 = vmatpush.bf16.msra.mxu1 %v520_v2  ;;  %v508_v5 = vld [vmem:[#allocation7 + $0x20] sm:$0xff]  ;;  %v507_v6 = vld [vmem:[#allocation7 + $0x18] sm:$0xff]  ;;  %v506_v7 = vld [vmem:[#allocation7 + $0x10] sm:$0xff]  ;;  %s688_s29 = smov 8  }
  0x16   :  { %v505_v8 = vld [vmem:[#allocation7 + $0x8] sm:$0xff]  ;;  %v504_v9 = vld [vmem:[#allocation7] sm:$0xff]  ;;  %v503_v10 = vld [vmem:[#allocation4] sm:$0xff] }
  0x17   :  { %v518_v11 = vld [vmem:[#allocation9 + $0x28] sm:$0xff]  ;;  %v517_v12 = vld [vmem:[#allocation9 + $0x20] sm:$0xff]  ;;  %v516_v13 = vld [vmem:[#allocation9 + $0x18] sm:$0xff] }
  0x18   :  { %167 = vmatpush.bf16.msra.mxu0 %v510_v1  ;;  %v515_v14 = vld [vmem:[#allocation9 + $0x10] sm:$0xff]  ;;  %v514_v15 = vld [vmem:[#allocation9 + $0x8] sm:$0xff]  ;;  %v513_v16 = vld [vmem:[#allocation9] sm:$0xff] }
  0x19   :  { %263 = vmatpush.bf16.msra.mxu1 %v519_v3  ;;  %v529_v17 = vld [vmem:[#allocation10 + $0x38] sm:$0xff]  ;;  %v528_v18 = vld [vmem:[#allocation10 + $0x30] sm:$0xff]  ;;  %v549_v20 = vld [vmem:[%s755_s2] ss:$0 sm:$0xff] }
  0x1a   :  { %358 = vmatpush.bf16.msra.mxu2 %v529_v17  ;;  %v527_v28 = vld [vmem:[#allocation10 + $0x28] sm:$0xff]  ;;  %v526_v29 = vld [vmem:[#allocation10 + $0x20] sm:$0xff]  ;;  %v525_v30 = vld [vmem:[#allocation10 + $0x18] sm:$0xff] }
  0x1b   :  { %v524_v31 = vld [vmem:[#allocation10 + $0x10] sm:$0xff]  ;;  %v523_v32 = vld [vmem:[#allocation10 + $0x8] sm:$0xff]  ;;  %v522_v33 = vld [vmem:[#allocation10] sm:$0xff] }
  0x1c   :  { %168 = vmatpush.bf16.msra.mxu0 %v509_v4  ;;  %v550_v35 = vld [vmem:[%s757_s4] ss:$0 sm:$0xff] }
  0x1d   :  { %264 = vmatpush.bf16.msra.mxu1 %v518_v11  ;;  %v551_v43 = vld [vmem:[%s759_s6] ss:$0 sm:$0xff] }
  0x1e   :  { %359 = vmatpush.bf16.msra.mxu2 %v528_v18 }
  0x20   :  { %169 = vmatpush.bf16.msra.mxu0 %v508_v5 }
  0x21   :  { %265 = vmatpush.bf16.msra.mxu1 %v517_v12 }
  0x22   :  { %360 = vmatpush.bf16.msra.mxu2 %v527_v28 }
  0x24   :  { %170 = vmatpush.bf16.msra.mxu0 %v507_v6 }
  0x25   :  { %266 = vmatpush.bf16.msra.mxu1 %v516_v13 }
  0x26   :  { %361 = vmatpush.bf16.msra.mxu2 %v526_v29 }
  0x28   :  { %171 = vmatpush.bf16.msra.mxu0 %v506_v7 }
  0x29   :  { %267 = vmatpush.bf16.msra.mxu1 %v515_v14 }
  0x2a   :  { %362 = vmatpush.bf16.msra.mxu2 %v525_v30 }
  0x2c   :  { %172 = vmatpush.bf16.msra.mxu0 %v505_v8 }
  0x2d   :  { %268 = vmatpush.bf16.msra.mxu1 %v514_v15 }
  0x2e   :  { %363 = vmatpush.bf16.msra.mxu2 %v524_v31 }
  0x30   :  { %173 = vmatpush.bf16.msra.mxu0 %v504_v9 }
  0x31   :  { %269 = vmatpush.bf16.msra.mxu1 %v513_v16 }
  0x32   :  { %364 = vmatpush.bf16.msra.mxu2 %v523_v32 }
  0x33   :  { %174 = vmatmul.bf16.vlgmr.msra.gmra.mxu0 %v503_v10 }
  0x36   :  { %365 = vmatpush.bf16.msra.mxu2 %v522_v33 }
  0xb0   :  { %v175_v19 = vpop.f32.mrf.mxu0 }
  0xb1   :  { %v176_v21 = vadd.f32 %v549_v20, %v175_v19 }
  0xb3   :  { %v180_v24 = vmax.f32 %v176_v21, 0.0 }
  0xb8   :  { %v177_v22 = vpop.f32.mrf.mxu0 }
  0xb9   :  { %v178_v23 = vadd.f32 %v549_v20, %v177_v22 }
  0xbb   :  { %v181_v25 = vmax.f32 %v178_v23, 0.0 }
  0xbd   :  { %v533_v26 = vpack.c.bf16 %v181_v25, %v180_v24 }
  0xbf   :  { %534 = vst [vmem:[#allocation2] sm:$0xff] %v533_v26  }
  0xc6   :  { %v512_v27 = vld [vmem:[#allocation2] sm:$0xff] }
  0xc7   :  { %270 = vmatmul.bf16.vlgmr.msra.gmra.mxu1 %v512_v27 }
 0x144   :  { %v271_v34 = vpop.f32.mrf.mxu1 }
 0x145   :  { %v272_v36 = vadd.f32 %v550_v35, %v271_v34 }
 0x147   :  { %v276_v39 = vmax.f32 %v272_v36, 0.0 }
 0x14c   :  { %v273_v37 = vpop.f32.mrf.mxu1 }
 0x14d   :  { %v274_v38 = vadd.f32 %v550_v35, %v273_v37 }
 0x14f   :  { %v277_v40 = vmax.f32 %v274_v38, 0.0 }
 0x151   :  { %v538_v41 = vpack.c.bf16 %v277_v40, %v276_v39 }
 0x153   :  { %539 = vst [vmem:[#allocation3] sm:$0xff] %v538_v41  }
 0x15a   :  { %v521_v42 = vld [vmem:[#allocation3] sm:$0xff] }
 0x15b   :  { %366 = vmatmul.bf16.vlgmr.msra.gmra.mxu2 %v521_v42 }
 0x1de   :  { %v367_v44 = vpop.f32.mrf.mxu2 }
 0x1df   :  { %v368_v45 = vadd.f32 %v551_v43, %v367_v44 }
 0x1e1   :  { %372 = vst [vmem:[#allocation12] sm:$0xff] %v368_v45 }
 0x1e6   :  { %v369_v46 = vpop.f32.mrf.mxu2 }
 0x1e7   :  { %v370_v47 = vadd.f32 %v551_v43, %v369_v46 }
 0x1e9   :  { %373 = vst [vmem:[#allocation12 + $0x8] sm:$0xff] %v370_v47 }
 0x1ea   :  { %386 = dma.vmem_to_hbm [thread:$0]  %s379_s25, 256, %s381_s27, [#allocation6], %s687_s28, %s687_s28, %s688_s29  }
 0x1eb   :  { %678 = dma.done.wait [#allocation6], 256  }
 0x1ec   :  { %679 = vsyncadd [#allocation6], 4294967040 }
 0x1ed   :  { %391 = vsyncpa [#allocation5], 1 }
 0x1ee   :  { %392 = vsyncpa [#allocation8], 1 }
 0x1ef   :  { %393 = vsyncpa [#allocation11], 1 }
 0x1f0   :  { %394 = vsyncpa [#allocation6], 1 }

// kernel: tpu_custom_call.1
= control target key start
LH: loop header
LB: loop body
LE: loop exit
PB: predicated region body
PF: predicated region fallthrough
CT: control target
= control target key end

     0   :  { %12 = vsyncpa [#allocation5], 0  ;;  %s753_s0 = inlined_call_operand.hbm [shape: bf16[16,128], index: 0, kind: input, shape index: {}]   ;;  %s754_s1 = inlined_call_operand.hbm [shape: bf16[128,128], index: 1, kind: input, shape index: {}]   ;;  %s755_s2 = inlined_call_operand.vmem [shape: f32[1,128], index: 2, kind: input, shape index: {}]   ;;  %s756_s3 = inlined_call_operand.hbm [shape: bf16[128,128], index: 3, kind: input, shape index: {}]   ;;  %s757_s4 = inlined_call_operand.vmem [shape: f32[1,128], index: 4, kind: input, shape index: {}]   ;;  %s758_s5 = inlined_call_operand.hbm [shape: bf16[128,128], index: 5, kind: input, shape index: {}]   ;;  %s759_s6 = inlined_call_operand.vmem [shape: f32[1,128], index: 6, kind: input, shape index: {}]   ;;  %s760_s7 = inlined_call_operand.hbm [shape: f32[16,128], index: 7, kind: output, shape index: {}]  }
   0x1   :  { %13 = vsyncpa [#allocation8], 0 }
   0x2   :  { %14 = vsyncpa [#allocation11], 0 }
   0x3   :  { %15 = vsyncpa [#allocation6], 0  ;;  %s33_s26 = sshll.u32 %s754_s1, 4  ;;  %s680_s27 = smov [#allocation7]   ;;  %s34_s26 = int_to_ptr.hbm [resolvable:$true] %s33_s26 }
   0x4   :  { %s35_s28 = sshll.u32 %s680_s27, 4  ;;  %s20_s8 = sshll.u32 %s753_s0, 4  ;;  %s36_s28 = int_to_ptr.vmem [resolvable:$true] %s35_s28  ;;  %s21_s8 = int_to_ptr.hbm [resolvable:$true] %s20_s8 }
   0x5   :  { %s681_s9 = smov 64   ;;  %s682_s10 = smov 4  }
   0x6   :  { %41 = dma.hbm_to_vmem [thread:$0]  %s34_s26, 1024, %s36_s28, [#allocation8], %s681_s9, %s681_s9, %s682_s10  }
   0x7   :  { %s683_s11 = smov [#allocation4]   ;;  %s48_s15 = sshll.u32 %s756_s3, 4  ;;  %s49_s15 = int_to_ptr.hbm [resolvable:$true] %s48_s15 }
   0x8   :  { %s22_s12 = sshll.u32 %s683_s11, 4  ;;  %s63_s17 = sshll.u32 %s758_s5, 4  ;;  %s23_s12 = int_to_ptr.vmem [resolvable:$true] %s22_s12  ;;  %s64_s17 = int_to_ptr.hbm [resolvable:$true] %s63_s17 }
   0x9   :  { %28 = dma.hbm_to_vmem [thread:$0]  %s21_s8, 128, %s23_s12, [#allocation5], %s681_s9, %s681_s9, %s682_s10  }
   0xa   :  { %s684_s18 = smov [#allocation9]   ;;  %s685_s0 = smov [#allocation10]  }
   0xb   :  { %s50_s19 = sshll.u32 %s684_s18, 4  ;;  %s65_s20 = sshll.u32 %s685_s0, 4  ;;  %s51_s19 = int_to_ptr.vmem [resolvable:$true] %s50_s19  ;;  %s66_s20 = int_to_ptr.vmem [resolvable:$true] %s65_s20 }
   0xc   :  { %56 = dma.hbm_to_vmem [thread:$0]  %s49_s15, 1024, %s51_s19, [#allocation8], %s681_s9, %s681_s9, %s682_s10  }
   0xd   :  { %71 = dma.hbm_to_vmem [thread:$0]  %s64_s17, 1024, %s66_s20, [#allocation11], %s681_s9, %s681_s9, %s682_s10  }
   0xe   :  { %672 = dma.done.wait [#allocation5], 128  }
   0xf   :  { %673 = vsyncadd [#allocation5], 4294967168 }
  0x10   :  { %674 = dma.done.wait [#allocation8], 2048  }
  0x11   :  { %675 = vsyncadd [#allocation8], 4294965248 }
  0x12   :  { %676 = dma.done.wait [#allocation11], 1024  }
  0x13   :  { %677 = vsyncadd [#allocation11], 4294966272  ;;  %v511_v0 = vld [vmem:[#allocation7 + $0x38] sm:$0xff]  ;;  %v510_v1 = vld [vmem:[#allocation7 + $0x30] sm:$0xff]  ;;  %s686_s24 = smov [#allocation12]   ;;  %s380_s27 = sshll.u32 %s760_s7, 4  ;;  %s381_s27 = int_to_ptr.hbm [resolvable:$true] %s380_s27 }
  0x14   :  { %166 = vmatpush.bf16.msra.mxu0 %v511_v0  ;;  %v520_v2 = vld [vmem:[#allocation9 + $0x38] sm:$0xff]  ;;  %v519_v3 = vld [vmem:[#allocation9 + $0x30] sm:$0xff]  ;;  %v509_v4 = vld [vmem:[#allocation7 + $0x28] sm:$0xff]  ;;  %s378_s25 = sshll.u32 %s686_s24, 4  ;;  %s687_s28 = smov 128   ;;  %s379_s25 = int_to_ptr.vmem [resolvable:$true] %s378_s25 }
  0x15   :  { %262 = vmatpush.bf16.msra.mxu1 %v520_v2  ;;  %v508_v5 = vld [vmem:[#allocation7 + $0x20] sm:$0xff]  ;;  %v507_v6 = vld [vmem:[#allocation7 + $0x18] sm:$0xff]  ;;  %v506_v7 = vld [vmem:[#allocation7 + $0x10] sm:$0xff]  ;;  %s688_s29 = smov 8  }
  0x16   :  { %v505_v8 = vld [vmem:[#allocation7 + $0x8] sm:$0xff]  ;;  %v504_v9 = vld [vmem:[#allocation7] sm:$0xff]  ;;  %v503_v10 = vld [vmem:[#allocation4] sm:$0xff] }
  0x17   :  { %v518_v11 = vld [vmem:[#allocation9 + $0x28] sm:$0xff]  ;;  %v517_v12 = vld [vmem:[#allocation9 + $0x20] sm:$0xff]  ;;  %v516_v13 = vld [vmem:[#allocation9 + $0x18] sm:$0xff] }
  0x18   :  { %167 = vmatpush.bf16.msra.mxu0 %v510_v1  ;;  %v515_v14 = vld [vmem:[#allocation9 + $0x10] sm:$0xff]  ;;  %v514_v15 = vld [vmem:[#allocation9 + $0x8] sm:$0xff]  ;;  %v513_v16 = vld [vmem:[#allocation9] sm:$0xff] }
  0x19   :  { %263 = vmatpush.bf16.msra.mxu1 %v519_v3  ;;  %v529_v17 = vld [vmem:[#allocation10 + $0x38] sm:$0xff]  ;;  %v528_v18 = vld [vmem:[#allocation10 + $0x30] sm:$0xff]  ;;  %v549_v20 = vld [vmem:[%s755_s2] ss:$0 sm:$0xff] }
  0x1a   :  { %358 = vmatpush.bf16.msra.mxu2 %v529_v17  ;;  %v527_v28 = vld [vmem:[#allocation10 + $0x28] sm:$0xff]  ;;  %v526_v29 = vld [vmem:[#allocation10 + $0x20] sm:$0xff]  ;;  %v525_v30 = vld [vmem:[#allocation10 + $0x18] sm:$0xff] }
  0x1b   :  { %v524_v31 = vld [vmem:[#allocation10 + $0x10] sm:$0xff]  ;;  %v523_v32 = vld [vmem:[#allocation10 + $0x8] sm:$0xff]  ;;  %v522_v33 = vld [vmem:[#allocation10] sm:$0xff] }
  0x1c   :  { %168 = vmatpush.bf16.msra.mxu0 %v509_v4  ;;  %v550_v35 = vld [vmem:[%s757_s4] ss:$0 sm:$0xff] }
  0x1d   :  { %264 = vmatpush.bf16.msra.mxu1 %v518_v11  ;;  %v551_v43 = vld [vmem:[%s759_s6] ss:$0 sm:$0xff] }
  0x1e   :  { %359 = vmatpush.bf16.msra.mxu2 %v528_v18 }
  0x20   :  { %169 = vmatpush.bf16.msra.mxu0 %v508_v5 }
  0x21   :  { %265 = vmatpush.bf16.msra.mxu1 %v517_v12 }
  0x22   :  { %360 = vmatpush.bf16.msra.mxu2 %v527_v28 }
  0x24   :  { %170 = vmatpush.bf16.msra.mxu0 %v507_v6 }
  0x25   :  { %266 = vmatpush.bf16.msra.mxu1 %v516_v13 }
  0x26   :  { %361 = vmatpush.bf16.msra.mxu2 %v526_v29 }
  0x28   :  { %171 = vmatpush.bf16.msra.mxu0 %v506_v7 }
  0x29   :  { %267 = vmatpush.bf16.msra.mxu1 %v515_v14 }
  0x2a   :  { %362 = vmatpush.bf16.msra.mxu2 %v525_v30 }
  0x2c   :  { %172 = vmatpush.bf16.msra.mxu0 %v505_v8 }
  0x2d   :  { %268 = vmatpush.bf16.msra.mxu1 %v514_v15 }
  0x2e   :  { %363 = vmatpush.bf16.msra.mxu2 %v524_v31 }
  0x30   :  { %173 = vmatpush.bf16.msra.mxu0 %v504_v9 }
  0x31   :  { %269 = vmatpush.bf16.msra.mxu1 %v513_v16 }
  0x32   :  { %364 = vmatpush.bf16.msra.mxu2 %v523_v32 }
  0x33   :  { %174 = vmatmul.bf16.vlgmr.msra.gmra.mxu0 %v503_v10 }
  0x36   :  { %365 = vmatpush.bf16.msra.mxu2 %v522_v33 }
  0xb0   :  { %v175_v19 = vpop.f32.mrf.mxu0 }
  0xb1   :  { %v176_v21 = vadd.f32 %v549_v20, %v175_v19 }
  0xb3   :  { %v180_v24 = vmax.f32 %v176_v21, 0.0 }
  0xb8   :  { %v177_v22 = vpop.f32.mrf.mxu0 }
  0xb9   :  { %v178_v23 = vadd.f32 %v549_v20, %v177_v22 }
  0xbb   :  { %v181_v25 = vmax.f32 %v178_v23, 0.0 }
  0xbd   :  { %v533_v26 = vpack.c.bf16 %v181_v25, %v180_v24 }
  0xbf   :  { %534 = vst [vmem:[#allocation2] sm:$0xff] %v533_v26  }
  0xc6   :  { %v512_v27 = vld [vmem:[#allocation2] sm:$0xff] }
  0xc7   :  { %270 = vmatmul.bf16.vlgmr.msra.gmra.mxu1 %v512_v27 }
 0x144   :  { %v271_v34 = vpop.f32.mrf.mxu1 }
 0x145   :  { %v272_v36 = vadd.f32 %v550_v35, %v271_v34 }
 0x147   :  { %v276_v39 = vmax.f32 %v272_v36, 0.0 }
 0x14c   :  { %v273_v37 = vpop.f32.mrf.mxu1 }
 0x14d   :  { %v274_v38 = vadd.f32 %v550_v35, %v273_v37 }
 0x14f   :  { %v277_v40 = vmax.f32 %v274_v38, 0.0 }
 0x151   :  { %v538_v41 = vpack.c.bf16 %v277_v40, %v276_v39 }
 0x153   :  { %539 = vst [vmem:[#allocation3] sm:$0xff] %v538_v41  }
 0x15a   :  { %v521_v42 = vld [vmem:[#allocation3] sm:$0xff] }
 0x15b   :  { %366 = vmatmul.bf16.vlgmr.msra.gmra.mxu2 %v521_v42 }
 0x1de   :  { %v367_v44 = vpop.f32.mrf.mxu2 }
 0x1df   :  { %v368_v45 = vadd.f32 %v551_v43, %v367_v44 }
 0x1e1   :  { %372 = vst [vmem:[#allocation12] sm:$0xff] %v368_v45 }
 0x1e6   :  { %v369_v46 = vpop.f32.mrf.mxu2 }
 0x1e7   :  { %v370_v47 = vadd.f32 %v551_v43, %v369_v46 }
 0x1e9   :  { %373 = vst [vmem:[#allocation12 + $0x8] sm:$0xff] %v370_v47 }
 0x1ea   :  { %386 = dma.vmem_to_hbm [thread:$0]  %s379_s25, 256, %s381_s27, [#allocation6], %s687_s28, %s687_s28, %s688_s29  }
 0x1eb   :  { %678 = dma.done.wait [#allocation6], 256  }
 0x1ec   :  { %679 = vsyncadd [#allocation6], 4294967040 }
 0x1ed   :  { %391 = vsyncpa [#allocation5], 1 }
 0x1ee   :  { %392 = vsyncpa [#allocation8], 1 }
 0x1ef   :  { %393 = vsyncpa [#allocation11], 1 }
 0x1f0   :  { %394 = vsyncpa [#allocation6], 1 }

</bundles_post_ra>
